<compile_context>
chip_gen: v6e
topology: v6e:2x2x1
jax: 0.10.0
libtpu: 0.0.40
codegen_flags: <defaults>
</compile_context>

<pallas_src>
import functools
import math

import jax
import jax.numpy as jnp
from jax import lax
from jax.experimental import pallas as pl
from jax.experimental.pallas import tpu as pltpu


def _flash_attn_kernel(q_ref, k_ref, v_ref, o_ref, m_ref, l_ref, acc_ref,
                       *, num_heads, head_dim):
    """One (batch, q-block, kv-block) grid step.

    q_ref : (1, tq, C) q rows, scale pre-folded (resident across the kv axis)
    k_ref : (1, tk, C) k rows for this kv step
    v_ref : (1, tk, C) v rows for this kv step
    o_ref : (1, tq, C) output block, written once at the last kv step
    m_ref, l_ref : (H, tq, 1)  f32 online-softmax running max / denominator
    acc_ref      : (H, tq, hd) f32 un-normalized per-head output accumulator
                   (leading-dim indexed -> full-width vreg traffic per head)
    """
    kv_i = pl.program_id(2)
    n_kv = pl.num_programs(2)

    @pl.when(kv_i == 0)
    def _init():
        m_ref[...] = jnp.full_like(m_ref, -jnp.inf)
        l_ref[...] = jnp.zeros_like(l_ref)
        acc_ref[...] = jnp.zeros_like(acc_ref)

    # Static loop over heads: each head is a static lane slice of the
    # lane-dense q/k/v blocks feeding the MXU; all read-modify-write state
    # (m, l, acc) is indexed on a leading (non-lane) dim.
    # TODO(synk): check the bundle dump for vreg spills at H >= 8, tq = 256+;
    # if present, switch to lax.fori_loop with bounded unroll.
    for h in range(num_heads):
        lo = h * head_dim
        hi = lo + head_dim

        q = q_ref[0, :, lo:hi]                   # (tq, hd)  scale already folded in
        k = k_ref[0, :, lo:hi]                   # (tk, hd)
        v = v_ref[0, :, lo:hi]                   # (tk, hd)

        # q @ k^T without materializing k.T: contract last dims directly.
        s = lax.dot_general(
            q, k, (((1,), (1,)), ((), ())),
            preferred_element_type=jnp.float32)            # (tq, tk) f32

        # Online softmax -- element-wise math kept in f32 (required on v5e).
        m_prev = m_ref[h]                                   # (tq, 1)
        l_prev = l_ref[h]
        m_new = jnp.maximum(m_prev, jnp.max(s, axis=-1, keepdims=True))
        alpha = jnp.exp(m_prev - m_new)                     # (tq, 1)
        p = jnp.exp(s - m_new)                              # (tq, tk) f32
        l_ref[h] = alpha * l_prev + jnp.sum(p, axis=-1, keepdims=True)
        m_ref[h] = m_new

        # PV matmul with operands in the input dtype, f32 accumulation.
        pv = jnp.dot(p.astype(v.dtype), v,
                     preferred_element_type=jnp.float32)    # (tq, hd) f32
        acc_ref[h] = alpha * acc_ref[h] + pv                # leading-dim RMW

    @pl.when(kv_i == n_kv - 1)
    def _finalize():
        # Assemble the lane-dense (tq, C) output once per q block.  The
        # reciprocal is exact (approx=False) for tight parity with the torch
        # reference; it runs once per q block so the cost is negligible.
        for h in range(num_heads):
            lo = h * head_dim
            hi = lo + head_dim
            inv_l = pl.reciprocal(l_ref[h], approx=False)   # (tq, 1)
            o_ref[0, :, lo:hi] = (acc_ref[h] * inv_l).astype(o_ref.dtype)


def _pick_tile(n, cap):
    """Largest tile <= cap dividing n, preferring multiples of 128."""
    if n <= cap:
        return n
    for t in (1024, 512, 384, 256, 128, 64, 32, 16, 8):
        if t <= cap and n % t == 0:
            return t
    # Fallback: full extent (disables tiling along this axis).
    # TODO(synk): pad N to a multiple of 128 + mask pad keys for e.g. N = 197.
    return n


def _mha_pallas(q, k, v, *, num_heads, q_tile, kv_tile, out_dtype):
    """Fused QK^T + online softmax + PV.  q/k/v/out are (B, N, C), q pre-scaled."""
    B, N, C = q.shape
    head_dim = C // num_heads
    n_q = N // q_tile
    n_kv = N // kv_tile

    kernel = functools.partial(
        _flash_attn_kernel, num_heads=num_heads, head_dim=head_dim)

    q_spec = pl.BlockSpec((1, q_tile, C), lambda b, qi, ki: (b, qi, 0))
    kv_spec = pl.BlockSpec((1, kv_tile, C), lambda b, qi, ki: (b, ki, 0))
    out_spec = pl.BlockSpec((1, q_tile, C), lambda b, qi, ki: (b, qi, 0))

    return pl.pallas_call(
        kernel,
        out_shape=jax.ShapeDtypeStruct((B, N, C), out_dtype),
        grid_spec=pltpu.PrefetchScalarGridSpec(
            num_scalar_prefetch=0,
            grid=(B, n_q, n_kv),
            in_specs=[q_spec, kv_spec, kv_spec],
            out_specs=out_spec,
            scratch_shapes=[
                pltpu.VMEM((num_heads, q_tile, 1), jnp.float32),        # m
                pltpu.VMEM((num_heads, q_tile, 1), jnp.float32),        # l
                pltpu.VMEM((num_heads, q_tile, head_dim), jnp.float32),  # acc
            ],
        ),
        compiler_params=pltpu.CompilerParams(
            # batch / q-block axes shard across TensorCores; kv axis carries
            # the online-softmax state -> must stay "arbitrary".
            dimension_semantics=("parallel", "parallel", "arbitrary"),
            # 48 MiB leaves headroom for Mosaic internal scratch on v7x
            # (64 MiB physical VMEM); safe on v5e/v6e (128 MiB).
            vmem_limit_bytes=48 * 1024 * 1024,
        ),
    )(q, k, v)


def attention_forward(x, qkv_weight, proj_weight, proj_bias, *,
                      num_heads=8, qk_scale=None, qkv_bias=None,
                      precision=None):
    """JAX/Pallas equivalent of Attention.forward.

    x: (B, N, C); qkv_weight: (3C, C) torch layout; proj_weight: (C, C);
    proj_bias: (C,).  Returns (B, N, C).
    """
    B, N, C = x.shape
    head_dim = C // num_heads
    scale = qk_scale if qk_scale is not None else head_dim ** (-0.5)

    # Fold the softmax scale into the q rows of the qkv weight (one-time
    # O(C^2) constant fold); single GEMM so x is read from HBM once, then a
    # contiguous last-dim split into q / k / v.
    w_all = jnp.concatenate([qkv_weight[:C] * scale, qkv_weight[C:]], axis=0)
    qkv = jnp.einsum("bnc,dc->bnd", x, w_all, precision=precision)
    if qkv_bias is not None:
        b_all = jnp.concatenate([qkv_bias[:C] * scale, qkv_bias[C:]], axis=0)
        qkv = qkv + b_all
    q, k, v = qkv[..., :C], qkv[..., C:2 * C], qkv[..., 2 * C:]

    q_tile = _pick_tile(N, cap=512)    # bigger q blocks -> less KV re-stream
    kv_tile = _pick_tile(N, cap=256)
    ctx = _mha_pallas(q, k, v, num_heads=num_heads,
                      q_tile=q_tile, kv_tile=kv_tile, out_dtype=x.dtype)

    # attn_drop / proj_drop default to p=0.0 -> identity.
    out = jnp.einsum("bnc,dc->bnd", ctx, proj_weight,
                     precision=precision) + proj_bias
    return out


def _reference(x, qkv_weight, proj_weight, proj_bias, *, num_heads=8,
               qk_scale=None, precision=None):
    """Pure-JAX replica of the PyTorch module's forward."""
    B, N, C = x.shape
    hd = C // num_heads
    scale = qk_scale if qk_scale is not None else hd ** (-0.5)
    qkv = jnp.einsum("bnc,dc->bnd", x, qkv_weight, precision=precision)
    qkv = qkv.reshape(B, N, 3, num_heads, hd).transpose(2, 0, 3, 1, 4)
    q, k, v = qkv[0], qkv[1], qkv[2]
    attn = jnp.einsum("bhnd,bhmd->bhnm", q, k, precision=precision) * scale
    attn = jax.nn.softmax(attn, axis=-1)
    o = jnp.einsum("bhnm,bhmd->bhnd", attn, v, precision=precision)
    o = o.transpose(0, 2, 1, 3).reshape(B, N, C)
    return jnp.einsum("bnc,dc->bnd", o, proj_weight,
                      precision=precision) + proj_bias


if __name__ == "__main__":
    # Small deterministic shapes: B=2, N=8, heads=2, head_dim=16 -> C=32.
    B, N, num_heads, head_dim = 2, 8, 2, 16
    C = num_heads * head_dim

    key = jax.random.PRNGKey(0)
    kx, kqkv, kproj, kbias = jax.random.split(key, 4)
    x = jax.random.normal(kx, (B, N, C), dtype=jnp.float32)
    qkv_w = jax.random.normal(kqkv, (3 * C, C), dtype=jnp.float32) / math.sqrt(C)
    proj_w = jax.random.normal(kproj, (C, C), dtype=jnp.float32) / math.sqrt(C)
    proj_b = 0.02 * jax.random.normal(kbias, (C,), dtype=jnp.float32)

    # HIGHEST precision on both sides only for the parity check; the
    # production default (precision=None) uses the fast bf16 MXU path.
    hp = jax.lax.Precision.HIGHEST
    out = attention_forward(x, qkv_w, proj_w, proj_b, num_heads=num_heads,
                            precision=hp)
    out = jax.block_until_ready(out)

    ref = _reference(x, qkv_w, proj_w, proj_b, num_heads=num_heads,
                     precision=hp)
    assert out.shape == (B, N, C), out.shape
    assert jnp.allclose(out, ref, atol=2e-3, rtol=2e-3), (
        f"mismatch vs reference: max abs diff = {jnp.max(jnp.abs(out - ref))}")

    print("KERNEL_OK")
</pallas_src>

<mosaic_0001>
module attributes {stable_mosaic.version = 11 : i64} {
  func.func @_flash_attn_kernel(%arg0: i32, %arg1: i32, %arg2: i32, %arg3: memref<1x8x32xf32, #tpu.memory_space<vmem>>, %arg4: memref<1x8x32xf32, #tpu.memory_space<vmem>>, %arg5: memref<1x8x32xf32, #tpu.memory_space<vmem>>, %arg6: memref<1x8x32xf32, #tpu.memory_space<vmem>>, %arg7: memref<2x8x1xf32, #tpu.memory_space<vmem>>, %arg8: memref<2x8x1xf32, #tpu.memory_space<vmem>>, %arg9: memref<2x8x16xf32, #tpu.memory_space<vmem>>) attributes {dimension_semantics = [#tpu.dimension_semantics<parallel>, #tpu.dimension_semantics<parallel>, #tpu.dimension_semantics<arbitrary>], iteration_bounds = array<i64: 2, 1, 1>, scalar_prefetch = 0 : i64, scratch_operands = 3 : i64, tpu.core_type = #tpu.core_type<tc>, window_params = [{transform_indices = @transform_0, window_bounds = array<i64: 1, 8, 32>}, {transform_indices = @transform_1, window_bounds = array<i64: 1, 8, 32>}, {transform_indices = @transform_2, window_bounds = array<i64: 1, 8, 32>}, {transform_indices = @transform_3, window_bounds = array<i64: 1, 8, 32>}]} {
    %c0_i32 = arith.constant 0 : i32
    %0 = arith.cmpi eq, %arg2, %c0_i32 : i32
    %1 = arith.extui %0 : i1 to i32
    %c0_i32_0 = arith.constant 0 : i32
    %2 = arith.cmpi ne, %1, %c0_i32_0 : i32
    scf.if %2 {
      %cst_61 = arith.constant 0xFF800000 : f32
      %82 = vector.broadcast %cst_61 : f32 to vector<2x8x1xf32>
      %c0_62 = arith.constant 0 : index
      %c0_63 = arith.constant 0 : index
      %c0_64 = arith.constant 0 : index
      %83 = vector.load %arg7[%c0_62, %c0_63, %c0_64] : memref<2x8x1xf32, #tpu.memory_space<vmem>>, vector<2x8x1xf32>
      tpu.vector_store %arg7[%c0_62, %c0_63, %c0_64], %82 {strides = array<i32>} : memref<2x8x1xf32, #tpu.memory_space<vmem>>, vector<2x8x1xf32>,
      %cst_65 = arith.constant 0.000000e+00 : f32
      %84 = vector.broadcast %cst_65 : f32 to vector<2x8x1xf32>
      %c0_66 = arith.constant 0 : index
      %c0_67 = arith.constant 0 : index
      %c0_68 = arith.constant 0 : index
      %85 = vector.load %arg8[%c0_66, %c0_67, %c0_68] : memref<2x8x1xf32, #tpu.memory_space<vmem>>, vector<2x8x1xf32>
      tpu.vector_store %arg8[%c0_66, %c0_67, %c0_68], %84 {strides = array<i32>} : memref<2x8x1xf32, #tpu.memory_space<vmem>>, vector<2x8x1xf32>,
      %cst_69 = arith.constant 0.000000e+00 : f32
      %86 = vector.broadcast %cst_69 : f32 to vector<2x8x16xf32>
      %c0_70 = arith.constant 0 : index
      %c0_71 = arith.constant 0 : index
      %c0_72 = arith.constant 0 : index
      %87 = vector.load %arg9[%c0_70, %c0_71, %c0_72] : memref<2x8x16xf32, #tpu.memory_space<vmem>>, vector<2x8x16xf32>
      tpu.vector_store %arg9[%c0_70, %c0_71, %c0_72], %86 {strides = array<i32>} : memref<2x8x16xf32, #tpu.memory_space<vmem>>, vector<2x8x16xf32>,
    } else {
    }
    %c0 = arith.constant 0 : index
    %c0_1 = arith.constant 0 : index
    %c0_2 = arith.constant 0 : index
    %3 = vector.load %arg3[%c0, %c0_1, %c0_2] : memref<1x8x32xf32, #tpu.memory_space<vmem>>, vector<1x8x16xf32>
    %4 = vector.shape_cast %3 : vector<1x8x16xf32> to vector<8x16xf32>
    %c0_3 = arith.constant 0 : index
    %c0_4 = arith.constant 0 : index
    %c0_5 = arith.constant 0 : index
    %5 = vector.load %arg4[%c0_3, %c0_4, %c0_5] : memref<1x8x32xf32, #tpu.memory_space<vmem>>, vector<1x8x16xf32>
    %6 = vector.shape_cast %5 : vector<1x8x16xf32> to vector<8x16xf32>
    %c0_6 = arith.constant 0 : index
    %c0_7 = arith.constant 0 : index
    %c0_8 = arith.constant 0 : index
    %7 = vector.load %arg5[%c0_6, %c0_7, %c0_8] : memref<1x8x32xf32, #tpu.memory_space<vmem>>, vector<1x8x16xf32>
    %8 = vector.shape_cast %7 : vector<1x8x16xf32> to vector<8x16xf32>
    %cst = arith.constant dense<0.000000e+00> : vector<8x8xf32>
    %9 = tpu.matmul %4, %6, %cst {dimension_numbers = #tpu.dot_dimension_numbers<[1], [1], [0], [0], [0, 0, 1, 0], [], []>} : vector<8x16xf32>, vector<8x16xf32>, vector<8x8xf32> -> vector<8x8xf32>
    %c0_9 = arith.constant 0 : index
    %c0_10 = arith.constant 0 : index
    %c0_11 = arith.constant 0 : index
    %10 = vector.load %arg7[%c0_9, %c0_10, %c0_11] : memref<2x8x1xf32, #tpu.memory_space<vmem>>, vector<1x8x1xf32>
    %11 = vector.shape_cast %10 : vector<1x8x1xf32> to vector<8x1xf32>
    %c0_12 = arith.constant 0 : index
    %c0_13 = arith.constant 0 : index
    %c0_14 = arith.constant 0 : index
    %12 = vector.load %arg8[%c0_12, %c0_13, %c0_14] : memref<2x8x1xf32, #tpu.memory_space<vmem>>, vector<1x8x1xf32>
    %13 = vector.shape_cast %12 : vector<1x8x1xf32> to vector<8x1xf32>
    %cst_15 = arith.constant dense<0xFF800000> : vector<8xf32>
    %14 = vector.multi_reduction <maximumf>, %9, %cst_15 [1] : vector<8x8xf32> to vector<8xf32>
    %15 = vector.shape_cast %14 : vector<8xf32> to vector<8x1xf32>
    %16 = arith.maximumf %11, %15 : vector<8x1xf32>
    %17 = arith.subf %11, %16 : vector<8x1xf32>
    %18 = math.exp %17 : vector<8x1xf32>
    %19 = vector.broadcast %16 : vector<8x1xf32> to vector<8x8xf32>
    %20 = arith.subf %9, %19 : vector<8x8xf32>
    %21 = math.exp %20 : vector<8x8xf32>
    %22 = arith.mulf %18, %13 : vector<8x1xf32>
    %cst_16 = arith.constant dense<0.000000e+00> : vector<8xf32>
    %23 = vector.multi_reduction <add>, %21, %cst_16 [1] : vector<8x8xf32> to vector<8xf32>
    %24 = vector.shape_cast %23 : vector<8xf32> to vector<8x1xf32>
    %25 = arith.addf %22, %24 : vector<8x1xf32>
    %c0_17 = arith.constant 0 : index
    %c0_18 = arith.constant 0 : index
    %c0_19 = arith.constant 0 : index
    %26 = vector.load %arg8[%c0_17, %c0_18, %c0_19] : memref<2x8x1xf32, #tpu.memory_space<vmem>>, vector<1x8x1xf32>
    %27 = vector.shape_cast %26 : vector<1x8x1xf32> to vector<8x1xf32>
    %28 = vector.shape_cast %25 : vector<8x1xf32> to vector<1x8x1xf32>
    tpu.vector_store %arg8[%c0_17, %c0_18, %c0_19], %28 {strides = array<i32>} : memref<2x8x1xf32, #tpu.memory_space<vmem>>, vector<1x8x1xf32>,
    %c0_20 = arith.constant 0 : index
    %c0_21 = arith.constant 0 : index
    %c0_22 = arith.constant 0 : index
    %29 = vector.load %arg7[%c0_20, %c0_21, %c0_22] : memref<2x8x1xf32, #tpu.memory_space<vmem>>, vector<1x8x1xf32>
    %30 = vector.shape_cast %29 : vector<1x8x1xf32> to vector<8x1xf32>
    %31 = vector.shape_cast %16 : vector<8x1xf32> to vector<1x8x1xf32>
    tpu.vector_store %arg7[%c0_20, %c0_21, %c0_22], %31 {strides = array<i32>} : memref<2x8x1xf32, #tpu.memory_space<vmem>>, vector<1x8x1xf32>,
    %cst_23 = arith.constant dense<0.000000e+00> : vector<8x16xf32>
    %32 = tpu.matmul %21, %8, %cst_23 {dimension_numbers = #tpu.dot_dimension_numbers<[1], [0], [0], [1], [0, 0, 1, 1], [], []>} : vector<8x8xf32>, vector<8x16xf32>, vector<8x16xf32> -> vector<8x16xf32>
    %c0_24 = arith.constant 0 : index
    %c0_25 = arith.constant 0 : index
    %c0_26 = arith.constant 0 : index
    %33 = vector.load %arg9[%c0_24, %c0_25, %c0_26] : memref<2x8x16xf32, #tpu.memory_space<vmem>>, vector<1x8x16xf32>
    %34 = vector.shape_cast %33 : vector<1x8x16xf32> to vector<8x16xf32>
    %35 = vector.broadcast %18 : vector<8x1xf32> to vector<8x16xf32>
    %36 = arith.mulf %35, %34 : vector<8x16xf32>
    %37 = arith.addf %36, %32 : vector<8x16xf32>
    %c0_27 = arith.constant 0 : index
    %c0_28 = arith.constant 0 : index
    %c0_29 = arith.constant 0 : index
    %38 = vector.load %arg9[%c0_27, %c0_28, %c0_29] : memref<2x8x16xf32, #tpu.memory_space<vmem>>, vector<1x8x16xf32>
    %39 = vector.shape_cast %38 : vector<1x8x16xf32> to vector<8x16xf32>
    %40 = vector.shape_cast %37 : vector<8x16xf32> to vector<1x8x16xf32>
    tpu.vector_store %arg9[%c0_27, %c0_28, %c0_29], %40 {strides = array<i32>} : memref<2x8x16xf32, #tpu.memory_space<vmem>>, vector<1x8x16xf32>,
    %c0_30 = arith.constant 0 : index
    %c0_31 = arith.constant 0 : index
    %c16 = arith.constant 16 : index
    %41 = vector.load %arg3[%c0_30, %c0_31, %c16] : memref<1x8x32xf32, #tpu.memory_space<vmem>>, vector<1x8x16xf32>
    %42 = vector.shape_cast %41 : vector<1x8x16xf32> to vector<8x16xf32>
    %c0_32 = arith.constant 0 : index
    %c0_33 = arith.constant 0 : index
    %c16_34 = arith.constant 16 : index
    %43 = vector.load %arg4[%c0_32, %c0_33, %c16_34] : memref<1x8x32xf32, #tpu.memory_space<vmem>>, vector<1x8x16xf32>
    %44 = vector.shape_cast %43 : vector<1x8x16xf32> to vector<8x16xf32>
    %c0_35 = arith.constant 0 : index
    %c0_36 = arith.constant 0 : index
    %c16_37 = arith.constant 16 : index
    %45 = vector.load %arg5[%c0_35, %c0_36, %c16_37] : memref<1x8x32xf32, #tpu.memory_space<vmem>>, vector<1x8x16xf32>
    %46 = vector.shape_cast %45 : vector<1x8x16xf32> to vector<8x16xf32>
    %cst_38 = arith.constant dense<0.000000e+00> : vector<8x8xf32>
    %47 = tpu.matmul %42, %44, %cst_38 {dimension_numbers = #tpu.dot_dimension_numbers<[1], [1], [0], [0], [0, 0, 1, 0], [], []>} : vector<8x16xf32>, vector<8x16xf32>, vector<8x8xf32> -> vector<8x8xf32>
    %c1 = arith.constant 1 : index
    %c0_39 = arith.constant 0 : index
    %c0_40 = arith.constant 0 : index
    %48 = vector.load %arg7[%c1, %c0_39, %c0_40] : memref<2x8x1xf32, #tpu.memory_space<vmem>>, vector<1x8x1xf32>
    %49 = vector.shape_cast %48 : vector<1x8x1xf32> to vector<8x1xf32>
    %c1_41 = arith.constant 1 : index
    %c0_42 = arith.constant 0 : index
    %c0_43 = arith.constant 0 : index
    %50 = vector.load %arg8[%c1_41, %c0_42, %c0_43] : memref<2x8x1xf32, #tpu.memory_space<vmem>>, vector<1x8x1xf32>
    %51 = vector.shape_cast %50 : vector<1x8x1xf32> to vector<8x1xf32>
    %cst_44 = arith.constant dense<0xFF800000> : vector<8xf32>
    %52 = vector.multi_reduction <maximumf>, %47, %cst_44 [1] : vector<8x8xf32> to vector<8xf32>
    %53 = vector.shape_cast %52 : vector<8xf32> to vector<8x1xf32>
    %54 = arith.maximumf %49, %53 : vector<8x1xf32>
    %55 = arith.subf %49, %54 : vector<8x1xf32>
    %56 = math.exp %55 : vector<8x1xf32>
    %57 = vector.broadcast %54 : vector<8x1xf32> to vector<8x8xf32>
    %58 = arith.subf %47, %57 : vector<8x8xf32>
    %59 = math.exp %58 : vector<8x8xf32>
    %60 = arith.mulf %56, %51 : vector<8x1xf32>
    %cst_45 = arith.constant dense<0.000000e+00> : vector<8xf32>
    %61 = vector.multi_reduction <add>, %59, %cst_45 [1] : vector<8x8xf32> to vector<8xf32>
    %62 = vector.shape_cast %61 : vector<8xf32> to vector<8x1xf32>
    %63 = arith.addf %60, %62 : vector<8x1xf32>
    %c1_46 = arith.constant 1 : index
    %c0_47 = arith.constant 0 : index
    %c0_48 = arith.constant 0 : index
    %64 = vector.load %arg8[%c1_46, %c0_47, %c0_48] : memref<2x8x1xf32, #tpu.memory_space<vmem>>, vector<1x8x1xf32>
    %65 = vector.shape_cast %64 : vector<1x8x1xf32> to vector<8x1xf32>
    %66 = vector.shape_cast %63 : vector<8x1xf32> to vector<1x8x1xf32>
    tpu.vector_store %arg8[%c1_46, %c0_47, %c0_48], %66 {strides = array<i32>} : memref<2x8x1xf32, #tpu.memory_space<vmem>>, vector<1x8x1xf32>,
    %c1_49 = arith.constant 1 : index
    %c0_50 = arith.constant 0 : index
    %c0_51 = arith.constant 0 : index
    %67 = vector.load %arg7[%c1_49, %c0_50, %c0_51] : memref<2x8x1xf32, #tpu.memory_space<vmem>>, vector<1x8x1xf32>
    %68 = vector.shape_cast %67 : vector<1x8x1xf32> to vector<8x1xf32>
    %69 = vector.shape_cast %54 : vector<8x1xf32> to vector<1x8x1xf32>
    tpu.vector_store %arg7[%c1_49, %c0_50, %c0_51], %69 {strides = array<i32>} : memref<2x8x1xf32, #tpu.memory_space<vmem>>, vector<1x8x1xf32>,
    %cst_52 = arith.constant dense<0.000000e+00> : vector<8x16xf32>
    %70 = tpu.matmul %59, %46, %cst_52 {dimension_numbers = #tpu.dot_dimension_numbers<[1], [0], [0], [1], [0, 0, 1, 1], [], []>} : vector<8x8xf32>, vector<8x16xf32>, vector<8x16xf32> -> vector<8x16xf32>
    %c1_53 = arith.constant 1 : index
    %c0_54 = arith.constant 0 : index
    %c0_55 = arith.constant 0 : index
    %71 = vector.load %arg9[%c1_53, %c0_54, %c0_55] : memref<2x8x16xf32, #tpu.memory_space<vmem>>, vector<1x8x16xf32>
    %72 = vector.shape_cast %71 : vector<1x8x16xf32> to vector<8x16xf32>
    %73 = vector.broadcast %56 : vector<8x1xf32> to vector<8x16xf32>
    %74 = arith.mulf %73, %72 : vector<8x16xf32>
    %75 = arith.addf %74, %70 : vector<8x16xf32>
    %c1_56 = arith.constant 1 : index
    %c0_57 = arith.constant 0 : index
    %c0_58 = arith.constant 0 : index
    %76 = vector.load %arg9[%c1_56, %c0_57, %c0_58] : memref<2x8x16xf32, #tpu.memory_space<vmem>>, vector<1x8x16xf32>
    %77 = vector.shape_cast %76 : vector<1x8x16xf32> to vector<8x16xf32>
    %78 = vector.shape_cast %75 : vector<8x16xf32> to vector<1x8x16xf32>
    tpu.vector_store %arg9[%c1_56, %c0_57, %c0_58], %78 {strides = array<i32>} : memref<2x8x16xf32, #tpu.memory_space<vmem>>, vector<1x8x16xf32>,
    %c0_i32_59 = arith.constant 0 : i32
    %79 = arith.cmpi eq, %arg2, %c0_i32_59 : i32
    %80 = arith.extui %79 : i1 to i32
    %c0_i32_60 = arith.constant 0 : i32
    %81 = arith.cmpi ne, %80, %c0_i32_60 : i32
    scf.if %81 {
      %c0_61 = arith.constant 0 : index
      %c0_62 = arith.constant 0 : index
      %c0_63 = arith.constant 0 : index
      %82 = vector.load %arg8[%c0_61, %c0_62, %c0_63] : memref<2x8x1xf32, #tpu.memory_space<vmem>>, vector<1x8x1xf32>
      %83 = vector.shape_cast %82 : vector<1x8x1xf32> to vector<8x1xf32>
      %84 = tpu.reciprocal %83 : vector<8x1xf32> -> vector<8x1xf32>
      %c0_64 = arith.constant 0 : index
      %c0_65 = arith.constant 0 : index
      %c0_66 = arith.constant 0 : index
      %85 = vector.load %arg9[%c0_64, %c0_65, %c0_66] : memref<2x8x16xf32, #tpu.memory_space<vmem>>, vector<1x8x16xf32>
      %86 = vector.shape_cast %85 : vector<1x8x16xf32> to vector<8x16xf32>
      %87 = vector.broadcast %84 : vector<8x1xf32> to vector<8x16xf32>
      %88 = arith.mulf %86, %87 : vector<8x16xf32>
      %c0_67 = arith.constant 0 : index
      %c0_68 = arith.constant 0 : index
      %c0_69 = arith.constant 0 : index
      %89 = vector.load %arg6[%c0_67, %c0_68, %c0_69] : memref<1x8x32xf32, #tpu.memory_space<vmem>>, vector<1x8x16xf32>
      %90 = vector.shape_cast %89 : vector<1x8x16xf32> to vector<8x16xf32>
      %91 = vector.shape_cast %88 : vector<8x16xf32> to vector<1x8x16xf32>
      tpu.vector_store %arg6[%c0_67, %c0_68, %c0_69], %91 {strides = array<i32>} : memref<1x8x32xf32, #tpu.memory_space<vmem>>, vector<1x8x16xf32>,
      %c1_70 = arith.constant 1 : index
      %c0_71 = arith.constant 0 : index
      %c0_72 = arith.constant 0 : index
      %92 = vector.load %arg8[%c1_70, %c0_71, %c0_72] : memref<2x8x1xf32, #tpu.memory_space<vmem>>, vector<1x8x1xf32>
      %93 = vector.shape_cast %92 : vector<1x8x1xf32> to vector<8x1xf32>
      %94 = tpu.reciprocal %93 : vector<8x1xf32> -> vector<8x1xf32>
      %c1_73 = arith.constant 1 : index
      %c0_74 = arith.constant 0 : index
      %c0_75 = arith.constant 0 : index
      %95 = vector.load %arg9[%c1_73, %c0_74, %c0_75] : memref<2x8x16xf32, #tpu.memory_space<vmem>>, vector<1x8x16xf32>
      %96 = vector.shape_cast %95 : vector<1x8x16xf32> to vector<8x16xf32>
      %97 = vector.broadcast %94 : vector<8x1xf32> to vector<8x16xf32>
      %98 = arith.mulf %96, %97 : vector<8x16xf32>
      %c0_76 = arith.constant 0 : index
      %c0_77 = arith.constant 0 : index
      %c16_78 = arith.constant 16 : index
      %99 = vector.load %arg6[%c0_76, %c0_77, %c16_78] : memref<1x8x32xf32, #tpu.memory_space<vmem>>, vector<1x8x16xf32>
      %100 = vector.shape_cast %99 : vector<1x8x16xf32> to vector<8x16xf32>
      %101 = vector.shape_cast %98 : vector<8x16xf32> to vector<1x8x16xf32>
      tpu.vector_store %arg6[%c0_76, %c0_77, %c16_78], %101 {strides = array<i32>} : memref<1x8x32xf32, #tpu.memory_space<vmem>>, vector<1x8x16xf32>,
    } else {
    }
    return
  }
  func.func @transform_0(%arg0: i32, %arg1: i32, %arg2: i32) -> (i32, i32, i32) {
    %c0_i32 = arith.constant 0 : i32
    %c0_i32_0 = arith.constant 0 : i32
    return %arg0, %arg1, %c0_i32 : i32, i32, i32
  }
  func.func @transform_1(%arg0: i32, %arg1: i32, %arg2: i32) -> (i32, i32, i32) {
    %c0_i32 = arith.constant 0 : i32
    %c0_i32_0 = arith.constant 0 : i32
    return %arg0, %arg2, %c0_i32 : i32, i32, i32
  }
  func.func @transform_2(%arg0: i32, %arg1: i32, %arg2: i32) -> (i32, i32, i32) {
    %c0_i32 = arith.constant 0 : i32
    %c0_i32_0 = arith.constant 0 : i32
    return %arg0, %arg2, %c0_i32 : i32, i32, i32
  }
  func.func @transform_3(%arg0: i32, %arg1: i32, %arg2: i32) -> (i32, i32, i32) {
    %c0_i32 = arith.constant 0 : i32
    %c0_i32_0 = arith.constant 0 : i32
    return %arg0, %arg1, %c0_i32 : i32, i32, i32
  }
}

</mosaic_0001>

<bundles_post_ra>
// kernel: tpu_custom_call.1
= control target key start
LH: loop header
LB: loop body
LE: loop exit
PB: predicated region body
PF: predicated region fallthrough
CT: control target
= control target key end

     0   :  { %s1430_s0 = inlined_call_operand.hbm [shape: f32[2,8,32], index: 0, kind: input, shape index: {}]   ;;  %s1431_s1 = inlined_call_operand.hbm [shape: f32[2,8,32], index: 1, kind: input, shape index: {}]   ;;  %s1432_s2 = inlined_call_operand.hbm [shape: f32[2,8,32], index: 2, kind: input, shape index: {}]   ;;  %s1433_s3 = inlined_call_operand.hbm [shape: f32[2,8,32], index: 3, kind: output, shape index: {}]  }
   0x1   :  { %1437 = sst [smem:[#allocation17_spill]] %s1431_s1 }
   0x2   :  { %8 = vsyncpa [#allocation6], 0 }
   0x3   :  { %10 = vsyncpa [#allocation6 + $0x1], 0 }
   0x4   :  { %11 = vsyncpa [#allocation9], 0 }
   0x5   :  { %13 = vsyncpa [#allocation9 + $0x1], 0 }
   0x6   :  { %14 = vsyncpa [#allocation7], 0 }
   0x7   :  { %16 = vsyncpa [#allocation7 + $0x1], 0  ;;  %s1199_s12 = smov 0   ;;  %s1201_s13 = smov 0  }
   0x8   :  { %s1203_s14 = smov 0   ;;  %s1205_s15 = smov 0  }
   0x9   :  { %s1207_s16 = smov 0   ;;  %s1209_s17 = smov 0  }
   0xa LB: > { %1438 = sst [smem:[#allocation15_spill]] %s1163_s16  ;;  %s1230_s18 = sadd.s32 4294967295, %s1167_s17   ;;  %s1167_s17 = sphi %s1209_s17, %s22_s17   ;;  %s1163_s16 = sphi %s1207_s16, %s1450_s16   ;;  %s1159_s15 = sphi %s1205_s15, %s1449_s15   ;;  %s1155_s14 = sphi %s1203_s14, %s1453_s14   ;;  %s1151_s13 = sphi %s1201_s13, %s1452_s13   ;;  %s1147_s12 = sphi %s1199_s12, %s1451_s12  }
   0xb   : > { %s855_s19 = sadd.s32 4294967294, %s1167_s17   ;;  %s41_s20 = sadd.s32 1, %s1163_s16 }
   0xc   : > { %s50_s21 = sadd.s32 1, %s1155_s14  ;;  %p43_p0 = scmp.ge.s32.totalorder %s41_s20, 2 }
   0xd   : > { %p57_p1 = scmp.ne.s32.totalorder %s1155_s14, %s1151_s13  ;;  %p58_p2 = scmp.eq.s32.totalorder %s1167_s17, 0 }
   0xe   : > { %p63_p3 = scmp.ne.s32.totalorder %s1151_s13, %s1147_s12  ;;  %s1455_s20 = smov (%p43_p0, %s41_s20), 0 }
   0xf   : > { %1439 = sst [smem:[#allocation16_spill]] %s1455_s20  ;;  %p1242_p4 = por %p58_p2, %p57_p1 }
  0x10   : > { %p64_p5 = scmp.eq.s32.totalorder %s1230_s18, 0  ;;  %s45_s23 = ssub.s32 %s1163_s16, %s1455_s20 }
  0x11   : > { %p145_p6 = scmp.eq.s32.totalorder %s1230_s18, 1  ;;  %p48_p7 = scmp.eq.s32.totalorder %s45_s23, 0 }
  0x12   : > { %p1250_p8 = por %p64_p5, %p63_p3  ;;  %p151_p10 = scmp.eq.s32.totalorder %s855_s19, 1 }
  0x13   : > { %p1254_p9 = por %p145_p6, %p57_p1  ;;  %p929_p13 = scmp.lt.s32.totalorder %s1167_s17, 2 }
  0x14   : > { %s1259_s26 = scalar_select %p48_p7, %s1155_s14, %s50_s21  }
  0x15   : > { %p1261_p11 = por %p151_p10, %p63_p3  ;;  %s1434_s28 = sand.u32 1, %s1155_s14  }
  0x16   : > { %s1270_s29 = sshll.u32 %s1434_s28, 3  ;;  %s1273_s30 = sshll.u32 %s1163_s16, 7 }
  0x17   : > { %p1277_p0 = pnand %p929_p13, %p1242_p4  ;;  %s190_s5 = sand.u32 1, %s1167_s17  }
  0x18   : > { %s1445_s1 = sld [smem:[#allocation17_spill]]  ;;  %s194_s9 = scalar_lea.vmem [#allocation8], %s1270_s29 }
  0x19   : > { %s202_s10 = sshll.u32 %s194_s9, 4  ;;  %p864_p1 = scmp.ge.s32.totalorder %s1167_s17, 1  ;;  %s203_s10 = int_to_ptr.vmem [resolvable:$true] %s202_s10 }
  0x1a   : > { %p226_p2 = scmp.lt.s32.totalorder %s1167_s17, 3  ;;  %s1289_s11 = scalar_lea.sflag [#allocation9], %s190_s5 }
  0x1b   : > { %p1001_p3 = pneg %p1277_p0  ;;  %s1012_s19 = scalar_lea.vmem %s203_s10, 128 }
  0x1c   : > { %p1013_p4 = scmp.ne.s32.totalorder %s203_s10, %s1012_s19  ;;  %s1169_s21 = smov [#allocation8]  }
  0x1d   : > { %s1017_s22 = sshll.u32 %s1169_s21, 4  ;;  %s1018_s22 = int_to_ptr.vmem [resolvable:$false] %s1017_s22 }
  0x1e   : > { %s200_s8 = scalar_lea.hbm %s1445_s1, %s1273_s30  ;;  %p1015_p5 = pnand %p1013_p4, %p1001_p3 }
  0x1f   : > { %s1019_s23 = scalar_lea.vmem %s1018_s22, 256  ;;  %p1020_p7 = scmp.lt.s32.totalorder %s203_s10, %s1018_s22 }
  0x20   : > { %p1016_p6 = pneg %p1015_p5  ;;  %p1021_p10 = scmp.lt.s32.totalorder %s1019_s23, %s1012_s19 }
  0x22   : > { %p1022_p13 = por %p1021_p10, %p1020_p7 }
  0x24   : > { %p1023_p12 = pnand %p1022_p13, %p1016_p6 }
  0x26   : > { %1026 = shalt.err (!%p1023_p12)
}
  0x27   : > { %921 = dma.hbm_to_vmem [thread:$0]  (!%p1277_p0), %s200_s8, 128, %s203_s10, %s1289_s11  }
  0x28   : > { %p1303_p4 = pnand %p864_p1, %p226_p2  ;;  %s181_s9 = scalar_lea.hbm %s1430_s0, %s1273_s30 }
  0x29   : > { %s175_s19 = scalar_lea.vmem [#allocation5], %s1270_s29  ;;  %s219_s28 = scalar_lea.hbm %s1432_s2, %s1273_s30 }
  0x2a   : > { %s183_s21 = sshll.u32 %s175_s19, 4  ;;  %s1447_s1 = sand.u32 1, %s1155_s14   ;;  %s184_s21 = int_to_ptr.vmem [resolvable:$true] %s183_s21 }
  0x2b   : > { %s172_s20 = scalar_lea.sflag [#allocation6], %s1447_s1  ;;  %s1040_s8 = scalar_lea.vmem %s184_s21, 128 }
  0x2c   : > { %p1041_p12 = scmp.ne.s32.totalorder %s184_s21, %s1040_s8  ;;  %s1170_s10 = smov [#allocation5]  }
  0x2d   : > { %s1045_s16 = sshll.u32 %s1170_s10, 4  ;;  %s1046_s16 = int_to_ptr.vmem [resolvable:$false] %s1045_s16 }
  0x2e   : > { %p1043_p1 = pnand %p1041_p12, %p1001_p3  ;;  %s1047_s6 = scalar_lea.vmem %s1046_s16, 256 }
  0x2f   : > { %p1048_p5 = scmp.lt.s32.totalorder %s184_s21, %s1046_s16  ;;  %p1049_p6 = scmp.lt.s32.totalorder %s1047_s6, %s1040_s8 }
  0x30   : > { %p1044_p2 = pneg %p1043_p1 }
  0x31   : > { %p1050_p7 = por %p1049_p6, %p1048_p5 }
  0x33   : > { %p1051_p10 = pnand %p1050_p7, %p1044_p2 }
  0x35   : > { %1054 = shalt.err (!%p1051_p10)
}
  0x36   : > { %918 = dma.hbm_to_vmem [thread:$0]  (!%p1277_p0), %s181_s9, 128, %s184_s21, %s172_s20  }
  0x37   : > { %s213_s1 = scalar_lea.vmem [#allocation10], %s1270_s29  ;;  %s1171_s22 = smov [#allocation10]  }
  0x38   : > { %s221_s7 = sshll.u32 %s213_s1, 4  ;;  %s1073_s16 = sshll.u32 %s1171_s22, 4  ;;  %s222_s7 = int_to_ptr.vmem [resolvable:$true] %s221_s7  ;;  %s1074_s16 = int_to_ptr.vmem [resolvable:$false] %s1073_s16 }
  0x39   : > { %s1068_s19 = scalar_lea.vmem %s222_s7, 128  ;;  %s1075_s23 = scalar_lea.vmem %s1074_s16, 256 }
  0x3a   : > { %p1069_p13 = scmp.ne.s32.totalorder %s222_s7, %s1068_s19  ;;  %p1076_p2 = scmp.lt.s32.totalorder %s222_s7, %s1074_s16 }
  0x3b   : > { %p1077_p5 = scmp.lt.s32.totalorder %s1075_s23, %s1068_s19 }
  0x3c   : > { %p1071_p12 = pnand %p1069_p13, %p1001_p3 }
  0x3d   : > { %p1078_p6 = por %p1077_p5, %p1076_p2 }
  0x3e   : > { %p1072_p1 = pneg %p1071_p12 }
  0x40   : > { %p1079_p7 = pnand %p1078_p6, %p1072_p1 }
  0x42   : > { %1082 = shalt.err (!%p1079_p7)
}
  0x43   : > { %924 = dma.hbm_to_vmem [thread:$0]  (!%p1277_p0), %s219_s28, 128, %s222_s7, %s1289_s11  }
  0x44   : > { %230 = sbr.rel (%p1303_p4) target bundleno = 1456 (0x5b0), region = 32  ;;  %s1338_s9 = sand.u32 (!%p1303_p4), 1, %s1151_s13  }
  0x45   : > { %s1341_s21 = sshll.u32 (!%p1303_p4), %s1338_s9, 3  ;;  %s233_s4 = scalar_lea.sflag (!%p1303_p4), [#allocation6], %s1338_s9 }
  0x46   : > { %s236_s8 = scalar_lea.vmem (!%p1303_p4), [#allocation5], %s1341_s21 }
  0x49   : > { %1134 = dma.done.wait (%p1250_p8), %s233_s4, 128  }
  0x4a   : > { %1136 = vsyncadd (%p1250_p8), %s233_s4, 4294967168  ;;  %s241_s28 = sand.u32 1, %s1230_s18   ;;  %s245_s11 = scalar_lea.vmem [#allocation8], %s1341_s21 }
  0x4b   : > { %s242_s30 = scalar_lea.sflag [#allocation9], %s241_s28 }
  0x4c   : > { %1138 = dma.done.wait (%p1250_p8), %s242_s30, 256  }
  0x4d   : > { %1140 = vsyncadd (%p1250_p8), %s242_s30, 4294967040  ;;  %vm296_vm0 = vcmask 130048   ;;  %v1172_v0 = vmov 0.0   ;;  %vm1173_vm1 = vmmov 0   ;;  %v300_v1 = vld [vmem:[%s245_s11] sm:$0xff]  ;;  %v299_v2 = vld [vmem:[%s236_s8] sm:$0xff] }
  0x4e   : > { %887 = vmatprep.subr.mxu0 %v1172_v0  ;;  %297 = vst.msk [vmem:[#allocation4] sm:$0xff] %vm296_vm0, %v1172_v0  ;;  %298 = vst.msk [vmem:[#allocation4 + $0x8] sm:$0xff] %vm296_vm0, %v1172_v0  ;;  %889 = vmatprep.mubr.msk.f32.mxu0 %vm1173_vm1, %v1172_v0  ;;  %vm291_vm2 = vcmask 7168   ;;  %v1174_v3 = vmov -inf   ;;  %vm381_vm3 = vcmask 64512   ;;  %v1175_v7 = vmov 0  }
  0x4f   : > { %892 = vmatprep.subr.mxu1 %v1172_v0  ;;  %894 = vmatprep.mubr.msk.f32.mxu1 %vm1173_vm1, %v1172_v0  ;;  %292 = vst.msk [vmem:[#allocation2] sm:$0xff] %vm291_vm2, %v1174_v3  ;;  %293 = vst.msk [vmem:[#allocation2 + $0x8] sm:$0xff] %vm291_vm2, %v1174_v3  ;;  %s1176_s18 = smov 112   ;;  %s254_s24 = scalar_lea.vmem [#allocation10], %s1341_s21  ;;  %vm709_vm4 = vcmask 261248  }
  0x50   : > { %888 = vmatpush3.xpose.msk.msra.mxu0 %vm296_vm0, %v300_v1  ;;  %294 = vst.msk [vmem:[#allocation3] sm:$0xff] %vm291_vm2, %v1172_v0  ;;  %295 = vst.msk [vmem:[#allocation3 + $0x8] sm:$0xff] %vm291_vm2, %v1172_v0  ;;  %985 = vset.pattern.permute.xlu0 %v1175_v7  ;;  %v301_v12 = vld [vmem:[%s254_s24] sm:$0xff]  ;;  %s286_s5 = scalar_lea.vmem [#allocation11], %s1341_s21  ;;  %s1177_s10 = smov 16  }
  0x51   : > { %902 = vmatprep.subr.mxu0 %v1172_v0  ;;  %986 = vset.pattern.permute.xlu1 %v1175_v7  ;;  %s876_s6 = sshll.u32 %s1159_s15, 7  ;;  %s726_s1 = sshll.u32 %s286_s5, 4  ;;  %s727_s1 = int_to_ptr.vmem [resolvable:$true] %s726_s1 }
  0x52   : > { %494 = vrot.lane.b32.xlu1 %v300_v1, %s1176_s18  ;;  %893 = vmatpush3.msra.mxu1 %v301_v12  ;;  %s1388_s22 = scalar_lea.hbm %s1433_s3, %s876_s6  ;;  %s712_s16 = scalar_lea.sflag [#allocation7], %s1338_s9 }
  0x53   : > { %890 = vmatmul.mubr.msk.f32.vlgmr.msra.gmra.mxu0 %vm296_vm0, %v299_v2  ;;  %897 = vmatprep.subr.mxu1 %v1172_v0  ;;  %s1083_s23 = scalar_lea.vmem %s727_s1, 128  ;;  %s1178_s20 = smov [#allocation11]  }
  0x54   : > { %904 = vmatprep.mubr.msk.f32.mxu0 %vm1173_vm1, %v1172_v0  ;;  %p1084_p8 = scmp.ne.s32.totalorder %s727_s1, %s1083_s23  ;;  %s1087_s29 = sshll.u32 %s1178_s20, 4  ;;  %s1088_s29 = int_to_ptr.vmem [resolvable:$false] %s1087_s29 }
  0x55   : > { %v478_v50 = vld [vmem:[#allocation4] sm:$0xff]  ;;  %v674_v59 = vld [vmem:[#allocation4 + $0x8] sm:$0xff]  ;;  %s1089_s15 = scalar_lea.vmem %s1088_s29, 256  ;;  %p1090_p4 = scmp.lt.s32.totalorder %s727_s1, %s1088_s29 }
  0x56   : > { %491 = vrot.lane.b32.xlu1 %v299_v2, %s1176_s18  ;;  %v379_v8 = vld [vmem:[#allocation2] sm:$0xff]  ;;  %v571_v24 = vld [vmem:[#allocation2 + $0x8] sm:$0xff]  ;;  %p1085_p0 = pnand %p1084_p8, %p1254_p9  ;;  %p1091_p10 = scmp.lt.s32.totalorder %s1089_s15, %s1083_s23 }
  0x57   : > { %v380_v39 = vld [vmem:[#allocation3] sm:$0xff]  ;;  %v573_v45 = vld [vmem:[#allocation3 + $0x8] sm:$0xff] }
  0x58   : > { %p1086_p3 = pneg %p1085_p0  ;;  %p1092_p13 = por %p1091_p10, %p1090_p4 }
  0x5a   : > { %p1093_p12 = pnand %p1092_p13, %p1086_p3 }
  0xc4   : > { %v495_v16 = vpop.permute.xlu1 %494 }
  0xc8   : > { %v492_v18 = vpop.permute.xlu1 %491 }
 0x113   : > { %v375_v4 = vpop.f32.mrf.mxu0 }
 0x114   : > { %v382_v5 = vsel %vm381_vm3, %v375_v4, -inf }
 0x115   : > { %383 = vmax.xlane.f32.xlu0 %v382_v5  ;;  %v891_v6 = vpop.f32.mrf.mxu0 }
 0x19e   : > { %v384_v9 = vpop.xlane.xlu0 %383 }
 0x19f   : > { %v385_v10 = vmax.f32 %v379_v8, %v384_v9 }
 0x1a1   : > { %v386_v11 = vsub.f32 %v379_v8, %v385_v10  ;;  %404 = vst.msk [vmem:[#allocation2] sm:$0xff] %vm291_vm2, %v385_v10  ;;  %391 = vperm.xlu0 %985, %v385_v10  }
 0x1a3   : > { %v387_v36 = vmul.f32 1.442695, %v386_v11 }
 0x1a5   : > { %597 = vrot.lane.b32.xlu0 %v301_v12, %s1176_s18 }
 0x21c   : > { %v392_v13 = vpop.permute.xlu0 %391 }
 0x21d   : > { %v394_v14 = vsub.f32 %v375_v4, %v392_v13 }
 0x21f   : > { %v395_v15 = vmul.f32 1.442695, %v394_v14 }
 0x220   : > { %v598_v28 = vpop.permute.xlu0 %597 }
 0x221   : > { %987 = vpow2.f32 %v395_v15  ;;  %903 = vmatpush3.msra.mxu0 %v598_v28 }
 0x22e   : > { %v988_v17 = vpop.eup %987 }
 0x22f   : > { %895 = vmatmul.mubr.msk.f32.vlgmr.msra.gmra.mxu1 %vm381_vm3, %v988_v17  ;;  %v398_v29 = vsel %vm381_vm3, %v988_v17, 0.0 }
 0x230   : > { %898 = vmatpush3.xpose.msk.msra.mxu1 %vm296_vm0, %v495_v16  ;;  %899 = vmatprep.mubr.msk.f32.mxu1 %vm1173_vm1, %v1172_v0 }
 0x233   : > { %900 = vmatmul.mubr.msk.f32.vlgmr.msra.gmra.mxu1 %vm296_vm0, %v492_v18 }
 0x2ef   : > { %v474_v19 = vpop.f32.mrf.mxu1 }
 0x2f1   : > { %v896_v20 = vpop.f32.mrf.mxu1 }
 0x2f3   : > { %v566_v21 = vpop.f32.mrf.mxu1 }
 0x2f4   : > { %v574_v22 = vsel %vm381_vm3, %v566_v21, -inf }
 0x2f5   : > { %575 = vmax.xlane.f32.xlu1 %v574_v22  ;;  %v901_v23 = vpop.f32.mrf.mxu1 }
 0x37e   : > { %v576_v25 = vpop.xlane.xlu1 %575 }
 0x37f   : > { %v577_v26 = vmax.f32 %v571_v24, %v576_v25 }
 0x381   : > { %v578_v27 = vsub.f32 %v571_v24, %v577_v26  ;;  %595 = vst.msk [vmem:[#allocation2 + $0x8] sm:$0xff] %vm291_vm2, %v577_v26  ;;  %583 = vperm.xlu1 %986, %v577_v26  }
 0x383   : > { %v579_v35 = vmul.f32 1.442695, %v578_v27 }
 0x3a5   : > { %399 = vadd.xlane.f32.xlu1 %v398_v29 }
 0x3fc   : > { %v584_v30 = vpop.permute.xlu1 %583 }
 0x3fd   : > { %v586_v31 = vsub.f32 %v566_v21, %v584_v30 }
 0x3ff   : > { %v587_v32 = vmul.f32 1.442695, %v586_v31 }
 0x401   : > { %989 = vpow2.f32 %v587_v32 }
 0x402   : > { %991 = vpow2.f32 %v579_v35 }
 0x403   : > { %993 = vpow2.f32 %v387_v36 }
 0x40e   : > { %v990_v33 = vpop.eup %989 }
 0x40f   : > { %905 = vmatmul.mubr.msk.f32.vlgmr.msra.gmra.mxu0 %vm381_vm3, %v990_v33  ;;  %v590_v34 = vsel %vm381_vm3, %v990_v33, 0.0  ;;  %v992_v37 = vpop.eup %991 }
 0x410   : > { %591 = vadd.xlane.f32.xlu0 %v590_v34  ;;  %v994_v38 = vpop.eup %993  ;;  %v589_v46 = vmul.f32 %v992_v37, %v573_v45 }
 0x411   : > { %v397_v40 = vmul.f32 %v994_v38, %v380_v39 }
 0x426   : > { %677 = vperm.xlu0 %985, %v992_v37  }
 0x42a   : > { %481 = vperm.xlu0 %985, %v994_v38  }
 0x42e   : > { %v400_v41 = vpop.xlane.xlu1 %399 }
 0x42f   : > { %v401_v42 = vadd.f32 %v400_v41, %v397_v40 }
 0x431   : > { %403 = vst.msk [vmem:[#allocation3] sm:$0xff] %vm291_vm2, %v401_v42 }
 0x438   : > { %v686_v43 = vld [vmem:[#allocation3] sm:$0xff] }
 0x439   : > { %995 = vrcp.f32 %v686_v43 }
 0x446   : > { %v996_v44 = vpop.eup %995 }
 0x447   : > { %691 = vperm.xlu0 %985, %v996_v44  }
 0x499   : > { %v592_v47 = vpop.xlane.xlu0 %591 }
 0x49a   : > { %v593_v48 = vadd.f32 %v592_v47, %v589_v46 }
 0x49c   : > { %594 = vst.msk [vmem:[#allocation3 + $0x8] sm:$0xff] %vm291_vm2, %v593_v48 }
 0x4a1   : > { %v678_v49 = vpop.permute.xlu0 %677 }
 0x4a2   : > { %v680_v60 = vmul.f32 %v678_v49, %v674_v59 }
 0x4a3   : > { %v696_v51 = vld [vmem:[#allocation3 + $0x8] sm:$0xff] }
 0x4a4   : > { %997 = vrcp.f32 %v696_v51 }
 0x4a5   : > { %v482_v52 = vpop.permute.xlu0 %481 }
 0x4a6   : > { %v484_v53 = vmul.f32 %v482_v52, %v478_v50 }
 0x4a8   : > { %v485_v54 = vadd.f32 %v484_v53, %v474_v19 }
 0x4aa   : > { %486 = vst.msk [vmem:[#allocation4] sm:$0xff] %vm296_vm0, %v485_v54 }
 0x4b1   : > { %v998_v55 = vpop.eup %997  ;;  %v688_v56 = vld [vmem:[#allocation4] sm:$0xff] }
 0x4b2   : > { %701 = vperm.xlu1 %986, %v998_v55  }
 0x4c2   : > { %v692_v57 = vpop.permute.xlu0 %691 }
 0x4c3   : > { %v694_v58 = vmul.f32 %v692_v57, %v688_v56 }
 0x4c5   : > { %695 = vst.msk [vmem:[%s286_s5] sm:$0xff] %vm296_vm0, %v694_v58 }
 0x4cf   : > { %v669_v61 = vpop.f32.mrf.mxu0 }
 0x4d0   : > { %v681_v62 = vadd.f32 %v680_v60, %v669_v61 }
 0x4d1   : > { %v906_v63 = vpop.f32.mrf.mxu0 }
 0x4d2   : > { %682 = vst.msk [vmem:[#allocation4 + $0x8] sm:$0xff] %vm296_vm0, %v681_v62 }
 0x4d9   : > { %v698_v1 = vld [vmem:[#allocation4 + $0x8] sm:$0xff] }
 0x52d   : > { %v702_v0 = vpop.permute.xlu1 %701 }
 0x52e   : > { %v704_v2 = vmul.f32 %v702_v0, %v698_v1 }
 0x530   : > { %706 = vrot.lane.b32.xlu0 %v704_v2, %s1177_s10 }
 0x5a2   : > { %v707_v3 = vpop.permute.xlu0 %706 }
 0x5a3   : > { %710 = vst.msk [vmem:[%s286_s5] sm:$0xff] %vm709_vm4, %v707_v3 }
 0x5a4   : > { %1096 = shalt.err (!%p1093_p12)
}
 0x5a5   : > { %s1097_s21 = scalar_lea.hbm %s1388_s22, 128  ;;  %s1101_s8 = scalar_lea.hbm %s1433_s3, 256 }
 0x5a6   : > { %p1098_p1 = scmp.ne.s32.totalorder %s1388_s22, %s1097_s21  ;;  %p1102_p6 = scmp.lt.s32.totalorder %s1388_s22, %s1433_s3 }
 0x5a7   : > { %p1103_p7 = scmp.lt.s32.totalorder %s1101_s8, %s1097_s21 }
 0x5a8   : > { %p1099_p2 = pnand %p1098_p1, %p1254_p9 }
 0x5a9   : > { %p1104_p8 = por %p1103_p7, %p1102_p6 }
 0x5aa   : > { %p1100_p5 = pneg %p1099_p2 }
 0x5ac   : > { %p1105_p0 = pnand %p1104_p8, %p1100_p5 }
 0x5ae   : > { %1108 = shalt.err (!%p1105_p0)
}
 0x5af   : > { %913 = dma.vmem_to_hbm [thread:$0]  (%p1254_p9), %s727_s1, 128, %s1388_s22, %s712_s16  }
 0x5b0 PF: > { %s738_s11 = sand.u32 1, %s1147_s12   ;;  %p1448_p3 = scmp.ge.s32.totalorder %s1167_s17, 2 }
 0x5b1   : > { %s739_s18 = scalar_lea.sflag [#allocation7], %s738_s11 }
 0x5b2   : > { %p926_p4 = pnand %p1448_p3, %p1261_p11 }
 0x5b4   : > { %p927_p10 = pneg %p926_p4 }
 0x5b6   : > { %1142 = dma.done.wait (%p927_p10), %s739_s18, 128  }
 0x5b7   : > { %1144 = vsyncadd (%p927_p10), %s739_s18, 4294967168  ;;  %s22_s17 = sadd.s32 1, %s1167_s17   ;;  %s1449_s15 = sld [smem:[#allocation15_spill]] }
 0x5b8   : > { %p19_p13 = scmp.ge.s32.totalorder %s22_s17, 4   ;;  %s1450_s16 = sld [smem:[#allocation16_spill]] }
 0x5b9   : > { %s1451_s12 = smov %s1151_s13  ;;  %s1452_s13 = smov %s1155_s14 }
 0x5ba   : > { %s1453_s14 = smov %s1259_s26  ;;  %21 = sbr.rel (!%p19_p13) target bundleno = 10 (0xa), region = 112 }
 0x5bf   :  { %744 = vsyncpa [#allocation6], 1 }
 0x5c0   :  { %746 = vsyncpa [#allocation6 + $0x1], 1 }
 0x5c1   :  { %747 = vsyncpa [#allocation9], 1 }
 0x5c2   :  { %749 = vsyncpa [#allocation9 + $0x1], 1 }
 0x5c3   :  { %750 = vsyncpa [#allocation7], 1 }
 0x5c4   :  { %752 = vsyncpa [#allocation7 + $0x1], 1 }

</bundles_post_ra>
